<compile_context>
chip_gen: v7x
topology: tpu7x:2x2x1
jax: 0.10.0
libtpu: 0.0.40
codegen_flags: <defaults>
</compile_context>

<pallas_src>
import functools

import jax
import jax.numpy as jnp
from jax import lax
from jax.experimental import pallas as pl
from jax.experimental.pallas import tpu as pltpu


def _mask_kernel(seed_ref, x_ref, o_ref, *, threshold31, tm, ln, use_hw_prng):
    shp = x_ref.shape  # (tm, ln)

    if use_hw_prng:
        # Hardware PRNG, seeded per tile with (base_seed, tile_id).
        pltpu.prng_seed(seed_ref[0], pl.program_id(0))
        raw = pltpu.prng_random_bits(shp)
        # 31 low bits as a non-negative int32 (robust to int32/uint32 return).
        u31 = (raw & jnp.array(0x7FFFFFFF, dtype=raw.dtype)).astype(jnp.int32)
    else:
        # Portable fallback: hash of the global flattened element index.
        i = pl.program_id(0)
        base = i.astype(jnp.uint32) * jnp.uint32(tm)
        row = lax.broadcasted_iota(jnp.uint32, shp, 0)
        col = lax.broadcasted_iota(jnp.uint32, shp, 1)
        pos = (base + row) * jnp.uint32(ln) + col
        s = seed_ref[0].astype(jnp.uint32)
        h = pos ^ (s * jnp.uint32(0x9E3779B9))
        # lowbias32-style integer finalizer (good mixing of consecutive ids).
        h = (h ^ (h >> 16)) * jnp.uint32(0x7FEB352D)
        h = (h ^ (h >> 15)) * jnp.uint32(0x846CA68B)
        h = h ^ (h >> 16)
        u31 = (h >> 1).astype(jnp.int32)

    # torch: keep iff rand > p   <=>   u31 > p * 2^31  (bias ~2^-31).
    keep = u31 > jnp.int32(threshold31)
    o_ref[...] = jnp.where(keep, x_ref[...], jnp.zeros_like(x_ref[...]))


def _choose_lanes(total):
    """Lane width: largest of (1024, 512, 256, 128) dividing total; otherwise
    pad to a multiple of 512 (or take the whole tiny array as one row)."""
    for cand in (1024, 512, 256, 128):
        if total % cand == 0:
            return cand
    if total >= 512:
        return 512
    return total


def _choose_row_tile(rows, ln, itemsize):
    """Row-tile bounded to ~2 MiB per block; ensure >=2 blocks when there is
    enough work so both v7x TensorCores are used."""
    sub_q = 8 * max(1, 4 // itemsize)  # 8 f32, 16 bf16, 32 i8
    target_rows = max(sub_q, (2 * 1024 * 1024) // max(1, ln * itemsize))
    if rows <= target_rows:
        tm = rows
        if rows >= 2 * sub_q:
            half = (rows + 1) // 2
            tm = ((half + sub_q - 1) // sub_q) * sub_q
    else:
        tm = (target_rows // sub_q) * sub_q
    return max(1, min(tm, rows))


def mask_layer(x, mask_percent=0.15, training=False, seed=0, use_hw_prng=None):
    """Equivalent of MaskLayer.forward."""
    if not training:
        # Inference path is the identity, exactly like the PyTorch module.
        return x

    if use_hw_prng is None:
        use_hw_prng = jax.default_backend() == "tpu"

    orig_shape = x.shape
    orig_dtype = x.dtype
    total = int(x.size)
    if total == 0:
        return x

    # Flatten fully and present a lane-dense 2-D slab (rows, LN).
    x_flat = x.reshape(-1)
    ln = _choose_lanes(total)
    pad = (-total) % ln
    if pad:
        x_flat = jnp.pad(x_flat, (0, pad))
    rows = (total + pad) // ln
    x2 = x_flat.reshape(rows, ln)

    itemsize = jnp.dtype(orig_dtype).itemsize
    tm = _choose_row_tile(rows, ln, itemsize)
    grid_m = pl.cdiv(rows, tm)

    threshold31 = max(0, min(int(float(mask_percent) * (1 << 31)), (1 << 31) - 1))
    seed_arr = jnp.asarray([seed], dtype=jnp.int32)

    out = pl.pallas_call(
        functools.partial(
            _mask_kernel,
            threshold31=threshold31,
            tm=tm,
            ln=ln,
            use_hw_prng=use_hw_prng,
        ),
        out_shape=jax.ShapeDtypeStruct((rows, ln), orig_dtype),
        grid_spec=pltpu.PrefetchScalarGridSpec(
            num_scalar_prefetch=1,  # seed -> SMEM (also passed to index maps)
            grid=(grid_m,),
            in_specs=[pl.BlockSpec((tm, ln), lambda i, s: (i, 0))],
            out_specs=pl.BlockSpec((tm, ln), lambda i, s: (i, 0)),
        ),
        compiler_params=pltpu.CompilerParams(
            dimension_semantics=("parallel",),
        ),
    )(seed_arr, x2)

    out_flat = out.reshape(-1)
    if pad:
        out_flat = out_flat[:total]
    return out_flat.reshape(orig_shape)


if __name__ == "__main__":
    key = jax.random.PRNGKey(0)

    # Shape consistent with the module's usage: (batch=2, seq=8, hidden=32).
    x = jax.random.normal(key, (2, 8, 32), dtype=jnp.float32)

    # Inference path: identity.
    y_eval = jax.block_until_ready(mask_layer(x, training=False))
    assert y_eval.shape == x.shape
    assert jnp.array_equal(y_eval, x), "inference path must be identity"

    # Training path: random keep-mask applied inside the kernel.
    y = jax.block_until_ready(
        mask_layer(x, mask_percent=0.15, training=True, seed=42)
    )
    assert y.shape == x.shape, y.shape

    # Every output element is either exactly 0 (masked) or exactly x (kept).
    kept = y == x
    zeroed = y == 0.0
    assert bool(jnp.all(kept | zeroed)), "output must be x or 0 elementwise"

    # Masked fraction statistically close to mask_percent (only 512 samples).
    frac_masked = float(jnp.mean(zeroed.astype(jnp.float32)))
    assert 0.02 < frac_masked < 0.40, f"masked fraction {frac_masked} off"

    # Deterministic for a fixed seed.
    y2 = jax.block_until_ready(
        mask_layer(x, mask_percent=0.15, training=True, seed=42)
    )
    assert jnp.array_equal(y, y2), "same seed must give same mask"

    # Larger input exercising the multi-tile ("parallel") grid path.
    xb = jax.random.normal(key, (4, 128, 128), dtype=jnp.float32)
    yb = jax.block_until_ready(
        mask_layer(xb, mask_percent=0.15, training=True, seed=7)
    )
    assert yb.shape == xb.shape
    assert bool(jnp.all((yb == xb) | (yb == 0.0)))
    frac_b = float(jnp.mean((yb == 0.0).astype(jnp.float32)))
    assert 0.10 < frac_b < 0.20, f"masked fraction {frac_b} off (large input)"

    print("KERNEL_OK")
</pallas_src>

<mosaic_0001>
module attributes {stable_mosaic.version = 11 : i64} {
  func.func @_mask_kernel(%arg0: i32, %arg1: memref<1xi32, #tpu.memory_space<smem>>, %arg2: memref<1x512xf32, #tpu.memory_space<vmem>>, %arg3: memref<1x512xf32, #tpu.memory_space<vmem>>) attributes {dimension_semantics = [#tpu.dimension_semantics<parallel>], iteration_bounds = array<i64: 1>, scalar_prefetch = 1 : i64, scratch_operands = 0 : i64, tpu.core_type = #tpu.core_type<tc>, window_params = [{transform_indices = @transform_0, window_bounds = array<i64: 1, 512>}, {transform_indices = @transform_1, window_bounds = array<i64: 1, 512>}]} {
    %c1_i32 = arith.constant 1 : i32
    %0 = arith.muli %arg0, %c1_i32 : i32
    %1 = tpu.iota {dimensions = array<i32: 0>} : vector<1x512xi32>
    %2 = tpu.iota {dimensions = array<i32: 1>} : vector<1x512xi32>
    %3 = vector.broadcast %0 : i32 to vector<1x512xi32>
    %4 = arith.addi %3, %1 : vector<1x512xi32>
    %c512_i32 = arith.constant 512 : i32
    %5 = vector.broadcast %c512_i32 : i32 to vector<1x512xi32>
    %6 = arith.muli %4, %5 : vector<1x512xi32>
    %7 = arith.addi %6, %2 : vector<1x512xi32>
    %c0 = arith.constant 0 : index
    %8 = memref.load %arg1[%c0] : memref<1xi32, #tpu.memory_space<smem>>
    %c-1640531527_i32 = arith.constant -1640531527 : i32
    %9 = arith.muli %8, %c-1640531527_i32 : i32
    %10 = vector.broadcast %9 : i32 to vector<1x512xi32>
    %11 = arith.xori %7, %10 : vector<1x512xi32>
    %c16_i32 = arith.constant 16 : i32
    %12 = vector.broadcast %c16_i32 : i32 to vector<1x512xi32>
    %13 = arith.shrui %11, %12 : vector<1x512xi32>
    %14 = arith.xori %11, %13 : vector<1x512xi32>
    %c2146121005_i32 = arith.constant 2146121005 : i32
    %15 = vector.broadcast %c2146121005_i32 : i32 to vector<1x512xi32>
    %16 = arith.muli %14, %15 : vector<1x512xi32>
    %c15_i32 = arith.constant 15 : i32
    %17 = vector.broadcast %c15_i32 : i32 to vector<1x512xi32>
    %18 = arith.shrui %16, %17 : vector<1x512xi32>
    %19 = arith.xori %16, %18 : vector<1x512xi32>
    %c-2073254261_i32 = arith.constant -2073254261 : i32
    %20 = vector.broadcast %c-2073254261_i32 : i32 to vector<1x512xi32>
    %21 = arith.muli %19, %20 : vector<1x512xi32>
    %c16_i32_0 = arith.constant 16 : i32
    %22 = vector.broadcast %c16_i32_0 : i32 to vector<1x512xi32>
    %23 = arith.shrui %21, %22 : vector<1x512xi32>
    %24 = arith.xori %21, %23 : vector<1x512xi32>
    %c1_i32_1 = arith.constant 1 : i32
    %25 = vector.broadcast %c1_i32_1 : i32 to vector<1x512xi32>
    %26 = arith.shrui %24, %25 : vector<1x512xi32>
    %c322122547_i32 = arith.constant 322122547 : i32
    %27 = vector.broadcast %c322122547_i32 : i32 to vector<1x512xi32>
    %28 = arith.cmpi sgt, %26, %27 : vector<1x512xi32>
    %c0_2 = arith.constant 0 : index
    %c0_3 = arith.constant 0 : index
    %29 = vector.load %arg2[%c0_2, %c0_3] : memref<1x512xf32, #tpu.memory_space<vmem>>, vector<1x512xf32>
    %cst = arith.constant 0.000000e+00 : f32
    %30 = vector.broadcast %cst : f32 to vector<1x512xf32>
    %31 = arith.select %28, %29, %30 : vector<1x512xi1>, vector<1x512xf32>
    %c0_4 = arith.constant 0 : index
    %c0_5 = arith.constant 0 : index
    %32 = vector.load %arg3[%c0_4, %c0_5] : memref<1x512xf32, #tpu.memory_space<vmem>>, vector<1x512xf32>
    tpu.vector_store %arg3[%c0_4, %c0_5], %31 {strides = array<i32>} : memref<1x512xf32, #tpu.memory_space<vmem>>, vector<1x512xf32>,
    return
  }
  func.func @transform_0(%arg0: i32, %arg1: memref<1xi32, #tpu.memory_space<smem>>) -> (i32, i32) {
    %c0_i32 = arith.constant 0 : i32
    %c0_i32_0 = arith.constant 0 : i32
    return %arg0, %c0_i32 : i32, i32
  }
  func.func @transform_1(%arg0: i32, %arg1: memref<1xi32, #tpu.memory_space<smem>>) -> (i32, i32) {
    %c0_i32 = arith.constant 0 : i32
    %c0_i32_0 = arith.constant 0 : i32
    return %arg0, %c0_i32 : i32, i32
  }
}

</mosaic_0001>

<bundles_post_ra>
// kernel: tpu_custom_call.1
= control target key start
LH: loop header
LB: loop body
LE: loop exit
PB: predicated region body
PF: predicated region fallthrough
CT: control target
= control target key end

     0   :  { %8 = vsyncpa [#allocation5], 0  ;;  %s266_s0 = inlined_call_operand.<no memory space> [shape: s32[1], index: 0, kind: input, shape index: {}]   ;;  %s267_s1 = inlined_call_operand.hbm [shape: f32[1,512], index: 1, kind: input, shape index: {}]   ;;  %s268_s2 = inlined_call_operand.hbm [shape: f32[1,512], index: 2, kind: output, shape index: {}]  }
   0x1   :  { %9 = vsyncpa [#allocation6], 0  ;;  %s210_s9 = smov [#allocation4]   ;;  %s162_s13 = scalar_lea.hbm %s267_s1, 64 }
   0x2   :  { %s16_s10 = sshll.u32 %s210_s9, 4  ;;  %p163_p0 = scmp.ne.s32.totalorder %s267_s1, %s162_s13  ;;  %s17_s10 = int_to_ptr.vmem [resolvable:$true] %s16_s10 }
   0x3   :  { %p166_p1 = scmp.lt.u32.totalorder %s162_s13, %s267_s1 }
   0x5   :  { %p168_p2 = pnand %p166_p1, %p163_p0 }
   0x7   :  { %171 = shalt.err (!%p168_p2)
}
   0x8   :  { %s172_s18 = scalar_lea.vmem %s17_s10, 64  ;;  %p177_p4 = scmp.lt.s32.totalorder %s17_s10, %s17_s10 }
   0x9   :  { %p173_p3 = scmp.ne.s32.totalorder %s17_s10, %s172_s18  ;;  %p178_p5 = scmp.lt.s32.totalorder %s172_s18, %s172_s18 }
   0xb   :  { %p179_p6 = por %p178_p5, %p177_p4 }
   0xd   :  { %p180_p7 = pnand %p179_p6, %p173_p3 }
   0xf   :  { %183 = shalt.err (!%p180_p7)
}
  0x10   :  { %19 = dma.hbm_to_vmem [thread:$0]  %s267_s1, 64, %s17_s10, [#allocation5]  }
  0x11   :  { %206 = dma.done.wait [#allocation5], 64  }
  0x12   :  { %207 = vsyncadd [#allocation5], 4294967232  ;;  %v23_v0 = vlaneseq  ;;  %s38_s23 = smul.u32 2654435769, %s266_s0  ;;  %v211_v38 = vmov 1966171168  }
  0x13   :  { %v117_v39 = vunpack.c.l.s4 %v211_v38  ;;  %v84_v44 = vld [vmem:[#allocation4] sm:$0xf]  ;;  %s212_s0 = smov [#allocation7]  }
  0x14   :  { %v244_v1 = vshrl.u32 %v23_v0, 7  ;;  %v26_v2 = vand.u32 127, %v23_v0  ;;  %v39_v7 = vstv %s38_s23  ;;  %s150_s1 = sshll.u32 %s212_s0, 4  ;;  %vm141_vm4 = vcmp.lt.s32.totalorder %v23_v0, 512  ;;  %s151_s1 = int_to_ptr.vmem [resolvable:$true] %s150_s1 }
  0x15   :  { %v118_v53 = vunpack.c.0.s8 %v117_v39  ;;  %s184_s24 = scalar_lea.vmem %s151_s1, 64  ;;  %p189_p9 = scmp.lt.s32.totalorder %s151_s1, %s151_s1 }
  0x16   :  { %v27_v3 = vadd.s32 128, %v26_v2  ;;  %v28_v4 = vadd.s32 256, %v26_v2  ;;  %v29_v5 = vadd.s32 384, %v26_v2  ;;  %v32_v6 = vmul.u32 512, %v244_v1  ;;  %p185_p8 = scmp.ne.s32.totalorder %s151_s1, %s184_s24  ;;  %p190_p10 = scmp.lt.s32.totalorder %s184_s24, %s184_s24 }
  0x17   :  { %v88_v42 = vsub.s32 0, %v244_v1  ;;  %v92_v43 = vsub.s32 1, %v244_v1  ;;  %v96_v47 = vsub.s32 2, %v244_v1  ;;  %v100_v48 = vsub.s32 3, %v244_v1 }
  0x18   :  { %v33_v8 = vadd.s32 %v32_v6, %v26_v2  ;;  %v34_v9 = vadd.s32 %v32_v6, %v27_v3  ;;  %v35_v10 = vadd.s32 %v32_v6, %v28_v4  ;;  %v36_v11 = vadd.s32 %v32_v6, %v29_v5  ;;  %p191_p11 = por %p190_p10, %p189_p9 }
  0x19   :  { %v89_v56 = vrot.slane %v84_v44, %v88_v42  ;;  %v93_v57 = vrot.slane %v84_v44, %v92_v43  ;;  %v97_v60 = vrot.slane %v84_v44, %v96_v47  ;;  %v101_v61 = vrot.slane %v84_v44, %v100_v48 }
  0x1a   :  { %v40_v12 = vxor.u32 %v39_v7, %v33_v8  ;;  %v41_v13 = vxor.u32 %v39_v7, %v34_v9  ;;  %v42_v14 = vxor.u32 %v39_v7, %v35_v10  ;;  %v43_v15 = vxor.u32 %v39_v7, %v36_v11  ;;  %p192_p12 = pnand %p191_p11, %p185_p8 }
  0x1b   :  { %v121_v2 = vsub.s32 %v118_v53, %v244_v1 }
  0x1c   :  { %v44_v16 = vshrl.u32 %v40_v12, 16  ;;  %v45_v17 = vshrl.u32 %v41_v13, 16  ;;  %v46_v18 = vshrl.u32 %v42_v14, 16  ;;  %v47_v19 = vshrl.u32 %v43_v15, 16 }
  0x1e   :  { %v48_v20 = vxor.u32 %v44_v16, %v40_v12  ;;  %v49_v21 = vxor.u32 %v45_v17, %v41_v13  ;;  %v50_v22 = vxor.u32 %v46_v18, %v42_v14  ;;  %v51_v23 = vxor.u32 %v47_v19, %v43_v15 }
  0x20   :  { %v52_v24 = vmul.u32 2146121005, %v48_v20  ;;  %v53_v25 = vmul.u32 2146121005, %v49_v21 }
  0x21   :  { %v54_v26 = vmul.u32 2146121005, %v50_v22  ;;  %v55_v27 = vmul.u32 2146121005, %v51_v23 }
  0x22   :  { %v56_v28 = vshrl.u32 %v52_v24, 15  ;;  %v57_v29 = vshrl.u32 %v53_v25, 15 }
  0x23   :  { %v58_v30 = vshrl.u32 %v54_v26, 15  ;;  %v59_v31 = vshrl.u32 %v55_v27, 15 }
  0x24   :  { %v60_v32 = vxor.u32 %v56_v28, %v52_v24  ;;  %v61_v33 = vxor.u32 %v57_v29, %v53_v25 }
  0x25   :  { %v62_v34 = vxor.u32 %v58_v30, %v54_v26  ;;  %v63_v35 = vxor.u32 %v59_v31, %v55_v27 }
  0x26   :  { %v64_v36 = vmul.u32 2221713035, %v60_v32  ;;  %v65_v37 = vmul.u32 2221713035, %v61_v33 }
  0x27   :  { %v66_v40 = vmul.u32 2221713035, %v62_v34  ;;  %v67_v41 = vmul.u32 2221713035, %v63_v35 }
  0x28   :  { %v68_v45 = vshrl.u32 %v64_v36, 16  ;;  %v69_v46 = vshrl.u32 %v65_v37, 16 }
  0x29   :  { %v70_v49 = vshrl.u32 %v66_v40, 16  ;;  %v71_v50 = vshrl.u32 %v67_v41, 16 }
  0x2a   :  { %v72_v51 = vxor.u32 %v68_v45, %v64_v36  ;;  %v73_v52 = vxor.u32 %v69_v46, %v65_v37 }
  0x2b   :  { %v74_v54 = vxor.u32 %v70_v49, %v66_v40  ;;  %v75_v55 = vxor.u32 %v71_v50, %v67_v41 }
  0x2c   :  { %v76_v58 = vshrl.u32 %v72_v51, 1  ;;  %v77_v59 = vshrl.u32 %v73_v52, 1 }
  0x2d   :  { %v78_v62 = vshrl.u32 %v74_v54, 1  ;;  %v79_v63 = vshrl.u32 %v75_v55, 1 }
  0x2e   :  { %vm80_vm0 = vcmp.gt.s32.totalorder %v76_v58, 322122547  ;;  %vm81_vm1 = vcmp.gt.s32.totalorder %v77_v59, 322122547 }
  0x2f   :  { %vm82_vm2 = vcmp.gt.s32.totalorder %v78_v62, 322122547  ;;  %vm83_vm3 = vcmp.gt.s32.totalorder %v79_v63, 322122547  ;;  %v106_v3 = vsel %vm80_vm0, %v89_v56, 0.0  ;;  %v107_v4 = vsel %vm81_vm1, %v93_v57, 0.0 }
  0x30   :  { %v108_v5 = vsel %vm82_vm2, %v97_v60, 0.0  ;;  %v109_v6 = vsel %vm83_vm3, %v101_v61, 0.0  ;;  %v114_v7 = vcombine.low %v106_v3, %v107_v4 }
  0x31   :  { %v115_v8 = vcombine.low %v108_v5, %v109_v6 }
  0x32   :  { %v122_v9 = vrot.slane %v114_v7, %v121_v2 }
  0x33   :  { %v129_v10 = vrot.slane %v115_v8, %v121_v2 }
  0x35   :  { %v130_v11 = vcombine.low %v122_v9, %v129_v10 }
  0x37   :  { %v137_v12 = vrot.slane %v130_v11, %v121_v2 }
  0x39   :  { %143 = vst.msk [vmem:[#allocation7] sm:$0xf] %vm141_vm4, %v137_v12 }
  0x3a   :  { %195 = shalt.err (!%p192_p12)
}
  0x3b   :  { %s196_s27 = scalar_lea.hbm %s268_s2, 64 }
  0x3c   :  { %p197_p13 = scmp.ne.s32.totalorder %s268_s2, %s196_s27  ;;  %p200_p0 = scmp.lt.u32.totalorder %s196_s27, %s268_s2 }
  0x3e   :  { %p202_p1 = pnand %p200_p0, %p197_p13 }
  0x40   :  { %205 = shalt.err (!%p202_p1)
}
  0x41   :  { %153 = dma.vmem_to_hbm [thread:$0]  %s151_s1, 64, %s268_s2, [#allocation6]  }
  0x42   :  { %208 = dma.done.wait [#allocation6], 64  }
  0x43   :  { %209 = vsyncadd [#allocation6], 4294967232 }
  0x44   :  { %157 = vsyncpa [#allocation5], 1 }
  0x45   :  { %158 = vsyncpa [#allocation6], 1 }

</bundles_post_ra>
